<compile_context>
chip_gen: v7x
topology: tpu7x:2x2x1
jax: 0.10.0
libtpu: 0.0.40
codegen_flags: <defaults>
</compile_context>

<pallas_src>
import jax
import jax.numpy as jnp
from jax.experimental import pallas as pl
from jax.experimental.pallas import tpu as pltpu

_COMPUTE_DTYPE = jnp.float32   # bfloat16 recommended on v6e / v7x


def _round_up(x, m):
    return (x + m - 1) // m * m


def _complex_conv1d_kernel(x_ref, w_ref, b_ref, o_ref):
    """One (batch, L-tile) grid step: a single packed matmul + bias.

    x_ref : (1, C_cat_pad, TILE_L)  im2col'ed [real taps | imag taps] input slab
    w_ref : (CO_pad, C_cat_pad)     packed [[Wr, -Wi], [Wi, Wr]] weights (VMEM-resident)
    b_ref : (CO_pad, 1)             packed [br - bi | br + bi] bias      (VMEM-resident)
    o_ref : (1, CO_pad, TILE_L)     rows [0:C_out) = real, [C_out:2*C_out) = imag
    """
    acc = jnp.dot(w_ref[...], x_ref[0], preferred_element_type=jnp.float32)
    o_ref[0] = (acc + b_ref[...]).astype(o_ref.dtype)


def complex_conv1d(x, w_r, b_r, w_i, b_i):
    """x: complex64 (N, C_in, L_in) in PyTorch NCL layout.
    w_*: (C_out, C_in, K) float32, b_*: (C_out,) float32.
    Returns complex64 (N, C_out, L_out), L_out = L_in - K + 1."""
    N, C_in, L_in = x.shape
    C_out, _, K = w_r.shape
    L_out = L_in - K + 1                       # stride=1, padding=0, dilation=1

    # ---- tiling / padding choices ---------------------------------------
    c_cat = 2 * K * C_in                       # packed contraction depth
    c_cat_pad = _round_up(c_cat, 8)
    co_pad = _round_up(2 * C_out, 8)           # [real | imag] output rows (sublane-aligned)
    if L_out >= 512:
        tile_l = 512
    elif L_out >= 128:
        tile_l = 128
    else:
        tile_l = _round_up(L_out, 8)
    l_pad = _round_up(L_out, tile_l)

    # ---- input packing: im2col over K, [real taps | imag taps] on channel axis ----
    xr = jnp.real(x).astype(_COMPUTE_DTYPE)    # (N, C_in, L_in)
    xi = jnp.imag(x).astype(_COMPUTE_DTYPE)
    taps = [xr[:, :, k:k + L_out] for k in range(K)] + \
           [xi[:, :, k:k + L_out] for k in range(K)]
    x_cat = jnp.concatenate(taps, axis=1)      # (N, 2*K*C_in, L_out)
    x_cat = jnp.pad(x_cat, ((0, 0), (0, c_cat_pad - c_cat), (0, l_pad - L_out)))

    # ---- weight / bias packing (done once, outside the kernel) ----------
    # flat column index k*C_in + c matches the tap layout built above
    wr_kc = jnp.transpose(w_r, (0, 2, 1)).reshape(C_out, K * C_in)
    wi_kc = jnp.transpose(w_i, (0, 2, 1)).reshape(C_out, K * C_in)
    w_real_rows = jnp.concatenate([wr_kc, -wi_kc], axis=1)      # real = Wr*xr - Wi*xi
    w_imag_rows = jnp.concatenate([wi_kc, wr_kc], axis=1)       # imag = Wi*xr + Wr*xi
    w_cat = jnp.concatenate([w_real_rows, w_imag_rows], axis=0)  # (2*C_out, 2*K*C_in)
    w_cat = jnp.pad(w_cat, ((0, co_pad - 2 * C_out), (0, c_cat_pad - c_cat)))
    w_cat = w_cat.astype(_COMPUTE_DTYPE)

    b_cat = jnp.concatenate([b_r - b_i, b_r + b_i]).reshape(2 * C_out, 1)
    b_cat = jnp.pad(b_cat, ((0, co_pad - 2 * C_out), (0, 0))).astype(jnp.float32)

    # ---- pallas_call ------------------------------------------------------
    grid = (N, l_pad // tile_l)
    bytes_per_el = jnp.dtype(_COMPUTE_DTYPE).itemsize
    cost = pl.CostEstimate(
        flops=8 * N * L_out * K * C_in * C_out,
        transcendentals=0,
        bytes_accessed=(x_cat.size + w_cat.size) * bytes_per_el
        + b_cat.size * 4 + N * co_pad * l_pad * 4,
    )

    out = pl.pallas_call(
        _complex_conv1d_kernel,
        out_shape=jax.ShapeDtypeStruct((N, co_pad, l_pad), jnp.float32),
        grid=grid,
        in_specs=[
            pl.BlockSpec((1, c_cat_pad, tile_l), lambda n, j: (n, 0, j)),
            pl.BlockSpec((co_pad, c_cat_pad), lambda n, j: (0, 0)),   # resident weights
            pl.BlockSpec((co_pad, 1), lambda n, j: (0, 0)),           # resident bias
        ],
        out_specs=pl.BlockSpec((1, co_pad, tile_l), lambda n, j: (n, 0, j)),
        compiler_params=pltpu.CompilerParams(
            dimension_semantics=("parallel", "parallel"),
            vmem_limit_bytes=32 * 1024 * 1024,   # fits v7x's 64 MiB VMEM with headroom
        ),
        cost_estimate=cost,
    )(x_cat, w_cat, b_cat)

    out = out[:, :, :L_out]
    o_r = out[:, :C_out, :]
    o_i = out[:, C_out:2 * C_out, :]
    return jax.lax.complex(o_r, o_i).astype(jnp.complex64)


def _reference(x, w_r, b_r, w_i, b_i):
    """Pure-JAX reference matching PyTorch ComplexConv1d.forward."""
    def conv1d(xreal, w, b):
        out = jax.lax.conv_general_dilated(
            xreal, w, window_strides=(1,), padding='VALID',
            dimension_numbers=('NCH', 'OIH', 'NCH'))
        return out + b[None, :, None]
    xr = jnp.real(x)
    xi = jnp.imag(x)
    real = conv1d(xr, w_r, b_r) - conv1d(xi, w_i, b_i)
    imag = conv1d(xi, w_r, b_r) + conv1d(xr, w_i, b_i)
    return jax.lax.complex(real, imag).astype(jnp.complex64)


if __name__ == "__main__":
    key = jax.random.PRNGKey(0)
    N, C_in, C_out, L, K = 2, 4, 6, 16, 3
    k1, k2, k3, k4, k5, k6 = jax.random.split(key, 6)

    # Deterministic, PyTorch-Conv1d-style uniform init: bound = 1/sqrt(C_in*K)
    bound = 1.0 / (C_in * K) ** 0.5
    w_r = jax.random.uniform(k1, (C_out, C_in, K), jnp.float32, -bound, bound)
    w_i = jax.random.uniform(k2, (C_out, C_in, K), jnp.float32, -bound, bound)
    b_r = jax.random.uniform(k3, (C_out,), jnp.float32, -bound, bound)
    b_i = jax.random.uniform(k4, (C_out,), jnp.float32, -bound, bound)

    xr = jax.random.normal(k5, (N, C_in, L), jnp.float32)
    xi = jax.random.normal(k6, (N, C_in, L), jnp.float32)
    x = jax.lax.complex(xr, xi)  # complex64, PyTorch NCL layout

    out = jax.jit(complex_conv1d)(x, w_r, b_r, w_i, b_i)
    out = jax.block_until_ready(out)

    ref = _reference(x, w_r, b_r, w_i, b_i)
    assert out.shape == (N, C_out, L - K + 1), out.shape
    assert out.dtype == jnp.complex64, out.dtype
    assert jnp.allclose(out, ref, atol=1e-4, rtol=1e-4), "mismatch vs reference"

    print("KERNEL_OK")
</pallas_src>

<mosaic_0001>
module attributes {stable_mosaic.version = 11 : i64} {
  func.func @_complex_conv1d_kernel(%arg0: i32, %arg1: i32, %arg2: memref<1x24x16xf32, #tpu.memory_space<vmem>>, %arg3: memref<16x24xf32, #tpu.memory_space<vmem>>, %arg4: memref<16x1xf32, #tpu.memory_space<vmem>>, %arg5: memref<1x16x16xf32, #tpu.memory_space<vmem>>) attributes {dimension_semantics = [#tpu.dimension_semantics<parallel>, #tpu.dimension_semantics<parallel>], iteration_bounds = array<i64: 2, 1>, scalar_prefetch = 0 : i64, scratch_operands = 0 : i64, tpu.core_type = #tpu.core_type<tc>, window_params = [{transform_indices = @transform_0, window_bounds = array<i64: 1, 24, 16>}, {pipeline_mode = #tpu.pipeline_mode<synchronous>, transform_indices = @transform_1, window_bounds = array<i64: 16, 24>}, {pipeline_mode = #tpu.pipeline_mode<synchronous>, transform_indices = @transform_2, window_bounds = array<i64: 16, 1>}, {transform_indices = @transform_3, window_bounds = array<i64: 1, 16, 16>}]} {
    %c0 = arith.constant 0 : index
    %c0_0 = arith.constant 0 : index
    %0 = vector.load %arg3[%c0, %c0_0] : memref<16x24xf32, #tpu.memory_space<vmem>>, vector<16x24xf32>
    %c0_1 = arith.constant 0 : index
    %c0_2 = arith.constant 0 : index
    %c0_3 = arith.constant 0 : index
    %1 = vector.load %arg2[%c0_1, %c0_2, %c0_3] : memref<1x24x16xf32, #tpu.memory_space<vmem>>, vector<1x24x16xf32>
    %2 = vector.shape_cast %1 : vector<1x24x16xf32> to vector<24x16xf32>
    %cst = arith.constant dense<0.000000e+00> : vector<16x16xf32>
    %3 = tpu.matmul %0, %2, %cst {dimension_numbers = #tpu.dot_dimension_numbers<[1], [0], [0], [1], [0, 0, 1, 1], [], []>} : vector<16x24xf32>, vector<24x16xf32>, vector<16x16xf32> -> vector<16x16xf32>
    %c0_4 = arith.constant 0 : index
    %c0_5 = arith.constant 0 : index
    %4 = vector.load %arg4[%c0_4, %c0_5] : memref<16x1xf32, #tpu.memory_space<vmem>>, vector<16x1xf32>
    %5 = vector.broadcast %4 : vector<16x1xf32> to vector<16x16xf32>
    %6 = arith.addf %3, %5 : vector<16x16xf32>
    %c0_6 = arith.constant 0 : index
    %c0_7 = arith.constant 0 : index
    %c0_8 = arith.constant 0 : index
    %7 = vector.load %arg5[%c0_6, %c0_7, %c0_8] : memref<1x16x16xf32, #tpu.memory_space<vmem>>, vector<1x16x16xf32>
    %8 = vector.shape_cast %7 : vector<1x16x16xf32> to vector<16x16xf32>
    %9 = vector.shape_cast %6 : vector<16x16xf32> to vector<1x16x16xf32>
    tpu.vector_store %arg5[%c0_6, %c0_7, %c0_8], %9 {strides = array<i32>} : memref<1x16x16xf32, #tpu.memory_space<vmem>>, vector<1x16x16xf32>,
    return
  }
  func.func @transform_0(%arg0: i32, %arg1: i32) -> (i32, i32, i32) {
    %c0_i32 = arith.constant 0 : i32
    %c0_i32_0 = arith.constant 0 : i32
    return %arg0, %c0_i32, %arg1 : i32, i32, i32
  }
  func.func @transform_1(%arg0: i32, %arg1: i32) -> (i32, i32) {
    %c0_i32 = arith.constant 0 : i32
    %c0_i32_0 = arith.constant 0 : i32
    %c0_i32_1 = arith.constant 0 : i32
    return %c0_i32, %c0_i32_0 : i32, i32
  }
  func.func @transform_2(%arg0: i32, %arg1: i32) -> (i32, i32) {
    %c0_i32 = arith.constant 0 : i32
    %c0_i32_0 = arith.constant 0 : i32
    %c0_i32_1 = arith.constant 0 : i32
    return %c0_i32, %c0_i32_0 : i32, i32
  }
  func.func @transform_3(%arg0: i32, %arg1: i32) -> (i32, i32, i32) {
    %c0_i32 = arith.constant 0 : i32
    %c0_i32_0 = arith.constant 0 : i32
    return %arg0, %c0_i32, %arg1 : i32, i32, i32
  }
}

</mosaic_0001>

<bundles_post_ra>
// kernel: custom-call.1
= control target key start
LH: loop header
LB: loop body
LE: loop exit
PB: predicated region body
PF: predicated region fallthrough
CT: control target
= control target key end

     0   :  { %s59_s0 = inlined_call_operand.hbm [shape: c64[2,4,16], index: 0, kind: input, shape index: {}]   ;;  %s60_s1 = inlined_call_operand.vmem [shape: f32[2,4,16], index: 1, kind: output, shape index: {}]  }
   0x1   :  { %s2_s8 = scalar_lea.hbm %s59_s0, 128 }
   0x2   :  { %3 = vsyncpa [#allocation0], 0  ;;  %s4_s11 = sshll.u32 %s60_s1, 4  ;;  %s34_s14 = scalar_lea.hbm %s59_s0, 256  ;;  %s5_s11 = int_to_ptr.vmem [resolvable:$true] %s4_s11 }
   0x3   :  { %p11_p0 = scmp.ne.s32.totalorder %s2_s8, %s34_s14  ;;  %p13_p1 = scmp.lt.u32.totalorder %s2_s8, %s59_s0 }
   0x4   :  { %p14_p2 = scmp.lt.u32.totalorder %s34_s14, %s34_s14  ;;  %p16_p4 = scmp.lt.u32.totalorder %s34_s14, %s2_s8 }
   0x6   :  { %p15_p3 = por %p14_p2, %p13_p1 }
   0x8   :  { %p17_p5 = por %p16_p4, %p15_p3 }
   0xa   :  { %p18_p6 = pnand %p17_p5, %p11_p0 }
   0xc   :  { %21 = shalt.err (!%p18_p6)  }
   0xd   :  { %s22_s17 = scalar_lea.vmem %s5_s11, 128  ;;  %p27_p8 = scmp.lt.s32.totalorder %s5_s11, %s5_s11 }
   0xe   :  { %p23_p7 = scmp.ne.s32.totalorder %s5_s11, %s22_s17  ;;  %p28_p9 = scmp.lt.s32.totalorder %s22_s17, %s22_s17 }
  0x10   :  { %p29_p10 = por %p28_p9, %p27_p8 }
  0x12   :  { %p30_p11 = pnand %p29_p10, %p23_p7 }
  0x14   :  { %33 = shalt.err (!%p30_p11)  }
  0x15   :  { %7 = dma.hbm_to_vmem [thread:$0]  %s2_s8, 128, %s5_s11, [#allocation0] }
  0x16   :  { %35 = dma.done.wait [#allocation0], 128  }
  0x17   :  { %36 = vsyncadd [#allocation0], 4294967168 }
  0x18   :  { %9 = vsyncpa [#allocation0], 1 }

// kernel: custom-call
= control target key start
LH: loop header
LB: loop body
LE: loop exit
PB: predicated region body
PF: predicated region fallthrough
CT: control target
= control target key end

     0   :  { %2 = vsyncpa [#allocation0], 0  ;;  %s61_s0 = inlined_call_operand.hbm [shape: c64[2,4,16], index: 0, kind: input, shape index: {}]   ;;  %s62_s1 = inlined_call_operand.vmem [shape: f32[2,4,16], index: 1, kind: output, shape index: {}]  }
   0x1   :  { %s3_s8 = sshll.u32 %s62_s1, 4  ;;  %s9_s11 = scalar_lea.hbm %s61_s0, 128  ;;  %s4_s8 = int_to_ptr.vmem [resolvable:$true] %s3_s8 }
   0x2   :  { %p10_p0 = scmp.ne.s32.totalorder %s61_s0, %s9_s11  ;;  %s11_s16 = scalar_lea.hbm %s61_s0, 256 }
   0x3   :  { %p12_p1 = scmp.lt.u32.totalorder %s11_s16, %s9_s11  ;;  %p13_p2 = scmp.lt.u32.totalorder %s9_s11, %s61_s0 }
   0x5   :  { %p14_p3 = por %p13_p2, %p12_p1 }
   0x7   :  { %p15_p4 = pnand %p14_p3, %p10_p0 }
   0x9   :  { %18 = shalt.err (!%p15_p4)  }
   0xa   :  { %s19_s1 = scalar_lea.vmem %s4_s8, 128  ;;  %p24_p6 = scmp.lt.s32.totalorder %s4_s8, %s4_s8 }
   0xb   :  { %p20_p5 = scmp.ne.s32.totalorder %s4_s8, %s19_s1  ;;  %p25_p7 = scmp.lt.s32.totalorder %s19_s1, %s19_s1 }
   0xd   :  { %p26_p8 = por %p25_p7, %p24_p6 }
   0xf   :  { %p27_p9 = pnand %p26_p8, %p20_p5 }
  0x11   :  { %30 = shalt.err (!%p27_p9)  }
  0x12   :  { %6 = dma.hbm_to_vmem [thread:$0]  %s61_s0, 128, %s4_s8, [#allocation0] }
  0x13   :  { %31 = dma.done.wait [#allocation0], 128  }
  0x14   :  { %32 = vsyncadd [#allocation0], 4294967168 }
  0x15   :  { %8 = vsyncpa [#allocation0], 1 }

// kernel: neg.1
= control target key start
LH: loop header
LB: loop body
LE: loop exit
PB: predicated region body
PF: predicated region fallthrough
CT: control target
= control target key end

     0   :  { %s24_s0 = inlined_call_operand.vmem [shape: f32[6,12], index: 0, kind: input, shape index: {}]   ;;  %s25_s1 = inlined_call_operand.vmem [shape: f32[6,12], index: 1, kind: output, shape index: {}]  }
   0x1   :  { %v2_v0 = vld [vmem:[%s24_s0] sm:$0x3f] }
   0x2   :  { %v5_v1 = vxor.u32 2147483648, %v2_v0 }
   0x4   :  { %7 = vst [vmem:[%s25_s1] sm:$0xff] %v5_v1 }

// kernel: custom-call.2
= control target key start
LH: loop header
LB: loop body
LE: loop exit
PB: predicated region body
PF: predicated region fallthrough
CT: control target
= control target key end

     0   :  { %s62_s0 = inlined_call_operand.vmem [shape: f32[2,6,14], index: 0, kind: input, shape index: {}]   ;;  %s63_s1 = inlined_call_operand.vmem [shape: f32[2,6,14], index: 1, kind: input, shape index: {}]   ;;  %s64_s2 = inlined_call_operand.vmem [shape: c64[2,6,14], index: 2, kind: output, shape index: {}]  }
   0x1   :  { %v5_v0 = vld [vmem:[%s62_s0] sm:$0xff]  ;;  %v18_v1 = vld [vmem:[%s62_s0 + $0x8] sm:$0xff] }
   0x2   :  { %v11_v2 = vld [vmem:[%s63_s1] sm:$0xff]  ;;  %6 = vst [vmem:[%s64_s2] sm:$0xff] %v5_v0  ;;  %19 = vst [vmem:[%s64_s2 + $0x8] sm:$0xff] %v18_v1  ;;  %v21_v3 = vld [vmem:[%s63_s1 + $0x8] sm:$0xff] }
   0x3   :  { %20 = vst [vmem:[%s64_s2 + $0x10] sm:$0xff] %v11_v2  ;;  %22 = vst [vmem:[%s64_s2 + $0x18] sm:$0xff] %v21_v3 }

// kernel: complex_conv1d.1
= control target key start
LH: loop header
LB: loop body
LE: loop exit
PB: predicated region body
PF: predicated region fallthrough
CT: control target
= control target key end

     0   :  { %s490_s12 = smov 0   ;;  %s492_s13 = smov 0   ;;  %s537_s0 = inlined_call_operand.vmem [shape: f32[2,24,16], index: 0, kind: input, shape index: {}]   ;;  %s538_s1 = inlined_call_operand.vmem [shape: f32[16,24], index: 1, kind: input, shape index: {}]   ;;  %s539_s2 = inlined_call_operand.vmem [shape: f32[16,1], index: 2, kind: input, shape index: {}]   ;;  %s540_s3 = inlined_call_operand.vmem [shape: f32[2,16,16], index: 3, kind: output, shape index: {}]  }
   0x1   :  { %s494_s14 = smov 0  }
   0x2 LB: > { %s25_s15 = sadd.s32 1, %s463_s13  ;;  %p391_p0 = scmp.ge.s32.totalorder %s467_s14, 1  ;;  %s467_s14 = sphi %s494_s14, %s13_s14   ;;  %s463_s13 = sphi %s492_s13, %s542_s13   ;;  %s459_s12 = sphi %s490_s12, %s541_s12  }
   0x3   : > { %p27_p1 = scmp.ge.s32.totalorder %s25_s15, 2  ;;  %p156_p2 = scmp.lt.s32.totalorder %s467_s14, 3 }
   0x5   : > { %s544_s15 = smov (%p27_p1, %s25_s15), 0  ;;  %p157_p3 = pnand %p391_p0, %p156_p2 }
   0x6   : > { %p186_p4 = scmp.lt.s32.totalorder (!%p157_p3), %s459_s12, 1  ;;  %v202_v0 = vld [vmem:[%s538_s1] sm:$0xff] (!%p157_p3)  ;;  %vm219_vm0 = vcmask (!%p157_p3), 195584   ;;  %v469_v2 = vmov (!%p157_p3), 0   ;;  %v208_v3 = vld [vmem:[%s539_s2 + $0x8] sm:$0xff] (!%p157_p3)  ;;  %vm301_vm1 = vcmask (!%p157_p3), 130048  }
   0x7   : > { %160 = sbr.rel (%p157_p3) target bundleno = 243 (0xf3), region = 32  ;;  %v207_v1 = vld [vmem:[%s539_s2] sm:$0xff] (!%p157_p3)  ;;  %411 = vmatprep.mubr.msk.f32.mxu0 (!%p157_p3), %vm219_vm0, %v202_v0  ;;  %444 = vset.pattern.permute.xlu0 (!%p157_p3), %v469_v2  ;;  %v203_v8 = vld [vmem:[%s538_s1 + $0x8] sm:$0xff] (!%p157_p3) }
   0x8   : > { %211 = vperm.xlu0 (!%p157_p3), %444, %v207_v1  }
   0xc   : > { %216 = vperm.xlu0 (!%p157_p3), %444, %v208_v3  }
   0xe   : > { %s546_s12 = smov (!%p186_p4, %s459_s12), 1 }
   0xf   : > { %s418_s22 = smul.u32 24, %s546_s12  ;;  %s399_s28 = sshll.u32 %s546_s12, 4 }
  0x10   : > { %s201_s4 = scalar_lea.vmem %s540_s3, %s399_s28 }
  0x11   : > { %s193_s25 = scalar_lea.vmem %s537_s0, %s418_s22 }
  0x12   : > { %v204_v4 = vld [vmem:[%s193_s25] sm:$0xff]  ;;  %v205_v5 = vld [vmem:[%s193_s25 + $0x8] sm:$0xff]  ;;  %v206_v7 = vld [vmem:[%s193_s25 + $0x10] sm:$0xff] }
  0x13   : > { %v414_v6 = vpack.c.bf16 %v205_v5, %v204_v4 }
  0x15   : > { %415 = vmatprep.subr.bf16.mxu0 %v414_v6 }
  0x16   : > { %417 = vmatpush3.bf16.msra.mxu0 %v414_v6 }
  0x17   : > { %409 = vmatprep.subr.mxu0 %v206_v7 }
  0x1a   : > { %410 = vmatpush3.msra.mxu0 %v206_v7 }
  0x1b   : > { %412 = vmatmul.mubr.msk.f32.vlgmr.msra.gmra.mrb[0].mxu0 %vm219_vm0, %v203_v8 }
  0x87   : > { %v212_v9 = vpop.permute.xlu0 %211 }
  0x8b   : > { %v217_v10 = vpop.permute.xlu0 %216 }
  0xee   : > { %v413_v11 = vpop.f32.mrb[0].mxu0 }
  0xef   : > { %v298_v12 = vadd.f32 %v413_v11, %v217_v10  ;;  %v292_v13 = vpop.f32.mrb[1].mxu0 }
  0xf0   : > { %v293_v14 = vadd.f32 %v292_v13, %v212_v9 }
  0xf1   : > { %303 = vst.msk [vmem:[%s201_s4 + $0x8] sm:$0xff] %vm301_vm1, %v298_v12 }
  0xf2   : > { %302 = vst.msk [vmem:[%s201_s4] sm:$0xff] %vm301_vm1, %v293_v14 }
  0xf3 PF: > { %s13_s14 = sadd.s32 1, %s467_s14   ;;  %s541_s12 = smov %s463_s13 }
  0xf4   : > { %p10_p5 = scmp.ge.s32.totalorder %s13_s14, 4   ;;  %s542_s13 = smov %s544_s15 }
  0xf6   :  { %12 = sbr.rel (!%p10_p5) target bundleno = 2 (0x2), region = 62 }

</bundles_post_ra>
